<compile_context>
chip_gen: v7x
topology: tpu7x:2x2x1
jax: 0.10.0
libtpu: 0.0.40
codegen_flags: <defaults>
</compile_context>

<pallas_src>
import numpy as np
import jax
import jax.numpy as jnp
from jax.experimental import pallas as pl
from jax.experimental.pallas import tpu as pltpu

# ----------------------------- model config ---------------------------------
INPUT_SIZE = 8
HIDDEN = [32, 32, 32, 32]
NUM_CLASSES = 16          # length L fed to the conv-transpose stack
BATCH = 4
EPS = 1e-5

# conv stack geometry (from the module): L -> 2L -> 2L -> 2L -> 2L
L0 = NUM_CLASSES
L1 = (L0 - 1) * 2 - 2 * 3 + 8   # convtrans1: stride 2, pad 3, k 8  -> 2*L0
L2 = (L1 - 1) * 1 - 2 * 2 + 5   # convtrans2: stride 1, pad 2, k 5  -> L1
L3 = (L2 - 1) * 1 - 2 * 2 + 5   # convtrans3                        -> L2


# ------------------------- dense conv-matrix builders -----------------------
def convtranspose1d_matrix(W, L_in, stride, padding):
    """W: (C_in, C_out, K) -> M: (C_in*L_in, C_out*L_out) s.t. y_flat = x_flat @ M."""
    C_in, C_out, K = W.shape
    L_out = (L_in - 1) * stride - 2 * padding + K
    M = np.zeros((C_in * L_in, C_out * L_out), dtype=np.float32)
    for ci in range(C_in):
        for co in range(C_out):
            for i in range(L_in):
                for k in range(K):
                    j = i * stride - padding + k
                    if 0 <= j < L_out:
                        M[ci * L_in + i, co * L_out + j] += W[ci, co, k]
    return M, L_out


def conv1d_k1_matrix(W, L):
    """Conv1d kernel_size=1, stride=1. W: (C_out, C_in, 1) -> (C_in*L, C_out*L)."""
    C_out, C_in, _ = W.shape
    M = np.zeros((C_in * L, C_out * L), dtype=np.float32)
    for co in range(C_out):
        for ci in range(C_in):
            for j in range(L):
                M[ci * L + j, co * L + j] = W[co, ci, 0]
    return M


# ------------------------------- Pallas kernel -------------------------------
# vecs row layout (all rows are 32 wide):
#   0..3  : b0, b1, b2, b3          (linear biases of hidden layers)
#   4     : b_tail                  (fused linear+conv-stack bias)
#   5..8  : g1, g2, g3, g4          (BN gammas)
#   9..12 : be1, be2, be3, be4      (BN betas)
#   13..15: zero padding (sublane alignment)
def nn_meta_kernel(x_ref, w0_ref, wstk_ref, vec_ref, out_ref):
    def lin(h, w, b):
        return jnp.dot(h, w, preferred_element_type=jnp.float32) + b

    def bn_relu(h, g, be):
        # two independent reductions (no serial reduce -> sub -> reduce chain)
        mu = jnp.mean(h, axis=0, keepdims=True)
        ms = jnp.mean(h * h, axis=0, keepdims=True)
        var = ms - mu * mu
        hn = (h - mu) * jax.lax.rsqrt(var + EPS)
        return jnp.maximum(hn * g + be, 0.0)

    b0 = vec_ref[0:1, :]
    b1 = vec_ref[1:2, :]
    b2 = vec_ref[2:3, :]
    b3 = vec_ref[3:4, :]
    bf = vec_ref[4:5, :]
    g1 = vec_ref[5:6, :]
    g2 = vec_ref[6:7, :]
    g3 = vec_ref[7:8, :]
    g4 = vec_ref[8:9, :]
    be1 = vec_ref[9:10, :]
    be2 = vec_ref[10:11, :]
    be3 = vec_ref[11:12, :]
    be4 = vec_ref[12:13, :]

    h = x_ref[...]
    h = bn_relu(lin(h, w0_ref[...], b0), g1, be1)
    h = bn_relu(lin(h, wstk_ref[0], b1), g2, be2)
    h = bn_relu(lin(h, wstk_ref[1], b2), g3, be3)
    h = bn_relu(lin(h, wstk_ref[2], b3), g4, be4)
    # fused: final Linear + ConvTranspose1d x3 + Conv1d (all linear) -> one GEMM
    out_ref[...] = lin(h, wstk_ref[3], bf)


def nn_metamaterial_forward(x, packed):
    w0, wstk, vecs = packed
    B = x.shape[0]
    nbytes = 4 * (x.size + w0.size + wstk.size + vecs.size + B * L3)
    flops = 2 * B * (INPUT_SIZE * HIDDEN[0]
                     + HIDDEN[0] * HIDDEN[1]
                     + HIDDEN[1] * HIDDEN[2]
                     + HIDDEN[2] * HIDDEN[3]
                     + HIDDEN[3] * L3) + 12 * B * sum(HIDDEN)
    return pl.pallas_call(
        nn_meta_kernel,
        out_shape=jax.ShapeDtypeStruct((B, L3), jnp.float32),
        cost_estimate=pl.CostEstimate(
            flops=flops, transcendentals=sum(HIDDEN), bytes_accessed=nbytes),
    )(x, w0, wstk, vecs)


# ------------------------------ parameter setup ------------------------------
def make_params(key):
    ks = iter(jax.random.split(key, 64))

    def rnd(shape, scale=0.1):
        return (scale * jax.random.normal(next(ks), shape, dtype=jnp.float32))

    dims = [INPUT_SIZE] + HIDDEN + [NUM_CLASSES]

    raw = []
    # 4 hidden linears with BN+ReLU, then final linear
    for li in range(4):
        W = rnd((dims[li], dims[li + 1]))          # stored as (in, out)
        b = rnd((1, dims[li + 1]))
        g = 1.0 + rnd((1, dims[li + 1]), 0.05)     # BN gamma
        be = rnd((1, dims[li + 1]), 0.05)          # BN beta
        raw += [W, b, g, be]
    W4 = rnd((dims[4], dims[5]))
    b4 = rnd((1, dims[5]))
    raw += [W4, b4]

    # conv-transpose / conv weights (PyTorch shapes), turned into dense matrices
    Wct1 = np.asarray(rnd((1, 4, 8)))
    bct1 = np.asarray(rnd((4,)))
    Wct2 = np.asarray(rnd((4, 4, 5)))
    bct2 = np.asarray(rnd((4,)))
    Wct3 = np.asarray(rnd((4, 4, 5)))
    bct3 = np.asarray(rnd((4,)))
    Wc1 = np.asarray(rnd((1, 4, 1)))
    bc1 = np.asarray(rnd((1,)))

    M1, l1 = convtranspose1d_matrix(Wct1, L0, stride=2, padding=3)
    M2, l2 = convtranspose1d_matrix(Wct2, l1, stride=1, padding=2)
    M3, l3 = convtranspose1d_matrix(Wct3, l2, stride=1, padding=2)
    M4 = conv1d_k1_matrix(Wc1, l3)
    assert (l1, l2, l3) == (L1, L2, L3)

    c1 = np.repeat(bct1, l1)[None, :].astype(np.float32)   # (1, 4*L1) channel-major
    c2 = np.repeat(bct2, l2)[None, :].astype(np.float32)
    c3 = np.repeat(bct3, l3)[None, :].astype(np.float32)
    c4 = np.repeat(bc1, l3)[None, :].astype(np.float32)

    raw += [jnp.asarray(M1), jnp.asarray(c1),
            jnp.asarray(M2), jnp.asarray(c2),
            jnp.asarray(M3), jnp.asarray(c3),
            jnp.asarray(M4), jnp.asarray(c4)]

    # ---- offline fold of the purely-linear tail (W4 -> M1 -> M2 -> M3 -> M4) --
    W4n, b4n = np.asarray(W4), np.asarray(b4)
    W_tail = W4n @ M1 @ M2 @ M3 @ M4                                   # (32, 32)
    b_tail = ((((b4n @ M1) + c1) @ M2 + c2) @ M3 + c3) @ M4 + c4       # (1, 32)

    # ---- pack kernel operands: w0 + one weight stack + one vector slab -------
    w0 = raw[0]
    wstk = jnp.stack([raw[4], raw[8], raw[12], jnp.asarray(W_tail)])   # (4,32,32)
    vecs = np.zeros((16, HIDDEN[0]), dtype=np.float32)
    vecs[0] = np.asarray(raw[1])[0]    # b0
    vecs[1] = np.asarray(raw[5])[0]    # b1
    vecs[2] = np.asarray(raw[9])[0]    # b2
    vecs[3] = np.asarray(raw[13])[0]   # b3
    vecs[4] = b_tail[0]                # fused tail bias
    vecs[5] = np.asarray(raw[2])[0]    # g1
    vecs[6] = np.asarray(raw[6])[0]    # g2
    vecs[7] = np.asarray(raw[10])[0]   # g3
    vecs[8] = np.asarray(raw[14])[0]   # g4
    vecs[9] = np.asarray(raw[3])[0]    # be1
    vecs[10] = np.asarray(raw[7])[0]   # be2
    vecs[11] = np.asarray(raw[11])[0]  # be3
    vecs[12] = np.asarray(raw[15])[0]  # be4

    packed = (w0, wstk, jnp.asarray(vecs))
    return packed, raw


# ------------------------------ pure-JAX reference ---------------------------
def reference_forward(x, raw):
    (w0, b0, g1, be1, w1, b1, g2, be2, w2, b2, g3, be3, w3, b3, g4, be4,
     w4, b4, m1, c1, m2, c2, m3, c3, m4, c4) = raw

    def bn_relu(h, g, be):
        mu = jnp.mean(h, axis=0, keepdims=True)
        var = jnp.mean((h - mu) ** 2, axis=0, keepdims=True)
        return jnp.maximum((h - mu) * jax.lax.rsqrt(var + EPS) * g + be, 0.0)

    h = bn_relu(x @ w0 + b0, g1, be1)
    h = bn_relu(h @ w1 + b1, g2, be2)
    h = bn_relu(h @ w2 + b2, g3, be3)
    h = bn_relu(h @ w3 + b3, g4, be4)
    h = h @ w4 + b4          # final linear (unsqueeze(1) -> flat channel-major)
    h = h @ m1 + c1          # convtrans1
    h = h @ m2 + c2          # convtrans2
    h = h @ m3 + c3          # convtrans3
    h = h @ m4 + c4          # conv1 (k=1)   -> squeeze(1)
    return h


# ----------------------------------- main ------------------------------------
if __name__ == "__main__":
    key = jax.random.PRNGKey(0)
    kx, kp = jax.random.split(key)
    x = jax.random.normal(kx, (BATCH, INPUT_SIZE), dtype=jnp.float32)
    packed, raw = make_params(kp)

    out = nn_metamaterial_forward(x, packed)
    out = jax.block_until_ready(out)

    ref = reference_forward(x, raw)
    assert out.shape == (BATCH, L3)
    np.testing.assert_allclose(np.asarray(out), np.asarray(ref), rtol=1e-4, atol=1e-4)
    print("KERNEL_OK")
</pallas_src>

<mosaic_0001>
module attributes {stable_mosaic.version = 11 : i64} {
  func.func @nn_meta_kernel(%arg0: memref<4x8xf32, #tpu.memory_space<vmem>>, %arg1: memref<8x32xf32, #tpu.memory_space<vmem>>, %arg2: memref<4x32x32xf32, #tpu.memory_space<vmem>>, %arg3: memref<16x32xf32, #tpu.memory_space<vmem>>, %arg4: memref<4x32xf32, #tpu.memory_space<vmem>>) attributes {dimension_semantics = [], scalar_prefetch = 0 : i64, scratch_operands = 0 : i64, tpu.core_type = #tpu.core_type<tc>} {
    %c0 = arith.constant 0 : index
    %c0_0 = arith.constant 0 : index
    %0 = vector.load %arg3[%c0, %c0_0] : memref<16x32xf32, #tpu.memory_space<vmem>>, vector<1x32xf32>
    %c1 = arith.constant 1 : index
    %c0_1 = arith.constant 0 : index
    %1 = vector.load %arg3[%c1, %c0_1] : memref<16x32xf32, #tpu.memory_space<vmem>>, vector<1x32xf32>
    %c2 = arith.constant 2 : index
    %c0_2 = arith.constant 0 : index
    %2 = vector.load %arg3[%c2, %c0_2] : memref<16x32xf32, #tpu.memory_space<vmem>>, vector<1x32xf32>
    %c3 = arith.constant 3 : index
    %c0_3 = arith.constant 0 : index
    %3 = vector.load %arg3[%c3, %c0_3] : memref<16x32xf32, #tpu.memory_space<vmem>>, vector<1x32xf32>
    %c4 = arith.constant 4 : index
    %c0_4 = arith.constant 0 : index
    %4 = vector.load %arg3[%c4, %c0_4] : memref<16x32xf32, #tpu.memory_space<vmem>>, vector<1x32xf32>
    %c5 = arith.constant 5 : index
    %c0_5 = arith.constant 0 : index
    %5 = vector.load %arg3[%c5, %c0_5] : memref<16x32xf32, #tpu.memory_space<vmem>>, vector<1x32xf32>
    %c6 = arith.constant 6 : index
    %c0_6 = arith.constant 0 : index
    %6 = vector.load %arg3[%c6, %c0_6] : memref<16x32xf32, #tpu.memory_space<vmem>>, vector<1x32xf32>
    %c7 = arith.constant 7 : index
    %c0_7 = arith.constant 0 : index
    %7 = vector.load %arg3[%c7, %c0_7] : memref<16x32xf32, #tpu.memory_space<vmem>>, vector<1x32xf32>
    %c8 = arith.constant 8 : index
    %c0_8 = arith.constant 0 : index
    %8 = vector.load %arg3[%c8, %c0_8] : memref<16x32xf32, #tpu.memory_space<vmem>>, vector<1x32xf32>
    %c9 = arith.constant 9 : index
    %c0_9 = arith.constant 0 : index
    %9 = vector.load %arg3[%c9, %c0_9] : memref<16x32xf32, #tpu.memory_space<vmem>>, vector<1x32xf32>
    %c10 = arith.constant 10 : index
    %c0_10 = arith.constant 0 : index
    %10 = vector.load %arg3[%c10, %c0_10] : memref<16x32xf32, #tpu.memory_space<vmem>>, vector<1x32xf32>
    %c11 = arith.constant 11 : index
    %c0_11 = arith.constant 0 : index
    %11 = vector.load %arg3[%c11, %c0_11] : memref<16x32xf32, #tpu.memory_space<vmem>>, vector<1x32xf32>
    %c12 = arith.constant 12 : index
    %c0_12 = arith.constant 0 : index
    %12 = vector.load %arg3[%c12, %c0_12] : memref<16x32xf32, #tpu.memory_space<vmem>>, vector<1x32xf32>
    %c0_13 = arith.constant 0 : index
    %c0_14 = arith.constant 0 : index
    %13 = vector.load %arg0[%c0_13, %c0_14] : memref<4x8xf32, #tpu.memory_space<vmem>>, vector<4x8xf32>
    %c0_15 = arith.constant 0 : index
    %c0_16 = arith.constant 0 : index
    %14 = vector.load %arg1[%c0_15, %c0_16] : memref<8x32xf32, #tpu.memory_space<vmem>>, vector<8x32xf32>
    %cst = arith.constant dense<0.000000e+00> : vector<4x32xf32>
    %15 = tpu.matmul %13, %14, %cst {dimension_numbers = #tpu.dot_dimension_numbers<[1], [0], [0], [1], [0, 0, 1, 1], [], []>} : vector<4x8xf32>, vector<8x32xf32>, vector<4x32xf32> -> vector<4x32xf32>
    %16 = vector.broadcast %0 : vector<1x32xf32> to vector<4x32xf32>
    %17 = arith.addf %15, %16 : vector<4x32xf32>
    %cst_17 = arith.constant dense<0.000000e+00> : vector<32xf32>
    %18 = vector.multi_reduction <add>, %17, %cst_17 [0] : vector<4x32xf32> to vector<32xf32>
    %19 = vector.shape_cast %18 : vector<32xf32> to vector<1x32xf32>
    %cst_18 = arith.constant 4.000000e+00 : f32
    %20 = vector.broadcast %cst_18 : f32 to vector<1x32xf32>
    %21 = arith.divf %19, %20 : vector<1x32xf32>
    %22 = arith.mulf %17, %17 : vector<4x32xf32>
    %cst_19 = arith.constant dense<0.000000e+00> : vector<32xf32>
    %23 = vector.multi_reduction <add>, %22, %cst_19 [0] : vector<4x32xf32> to vector<32xf32>
    %24 = vector.shape_cast %23 : vector<32xf32> to vector<1x32xf32>
    %cst_20 = arith.constant 4.000000e+00 : f32
    %25 = vector.broadcast %cst_20 : f32 to vector<1x32xf32>
    %26 = arith.divf %24, %25 : vector<1x32xf32>
    %27 = arith.mulf %21, %21 : vector<1x32xf32>
    %28 = arith.subf %26, %27 : vector<1x32xf32>
    %29 = vector.broadcast %21 : vector<1x32xf32> to vector<4x32xf32>
    %30 = arith.subf %17, %29 : vector<4x32xf32>
    %cst_21 = arith.constant 9.99999974E-6 : f32
    %31 = vector.broadcast %cst_21 : f32 to vector<1x32xf32>
    %32 = arith.addf %28, %31 : vector<1x32xf32>
    %33 = math.rsqrt %32 : vector<1x32xf32>
    %34 = vector.broadcast %33 : vector<1x32xf32> to vector<4x32xf32>
    %35 = arith.mulf %30, %34 : vector<4x32xf32>
    %36 = vector.broadcast %5 : vector<1x32xf32> to vector<4x32xf32>
    %37 = arith.mulf %35, %36 : vector<4x32xf32>
    %38 = vector.broadcast %9 : vector<1x32xf32> to vector<4x32xf32>
    %39 = arith.addf %37, %38 : vector<4x32xf32>
    %cst_22 = arith.constant 0.000000e+00 : f32
    %40 = vector.broadcast %cst_22 : f32 to vector<4x32xf32>
    %41 = arith.maximumf %39, %40 : vector<4x32xf32>
    %c0_23 = arith.constant 0 : index
    %c0_24 = arith.constant 0 : index
    %c0_25 = arith.constant 0 : index
    %42 = vector.load %arg2[%c0_23, %c0_24, %c0_25] : memref<4x32x32xf32, #tpu.memory_space<vmem>>, vector<1x32x32xf32>
    %43 = vector.shape_cast %42 : vector<1x32x32xf32> to vector<32x32xf32>
    %cst_26 = arith.constant dense<0.000000e+00> : vector<4x32xf32>
    %44 = tpu.matmul %41, %43, %cst_26 {dimension_numbers = #tpu.dot_dimension_numbers<[1], [0], [0], [1], [0, 0, 1, 1], [], []>} : vector<4x32xf32>, vector<32x32xf32>, vector<4x32xf32> -> vector<4x32xf32>
    %45 = vector.broadcast %1 : vector<1x32xf32> to vector<4x32xf32>
    %46 = arith.addf %44, %45 : vector<4x32xf32>
    %cst_27 = arith.constant dense<0.000000e+00> : vector<32xf32>
    %47 = vector.multi_reduction <add>, %46, %cst_27 [0] : vector<4x32xf32> to vector<32xf32>
    %48 = vector.shape_cast %47 : vector<32xf32> to vector<1x32xf32>
    %cst_28 = arith.constant 4.000000e+00 : f32
    %49 = vector.broadcast %cst_28 : f32 to vector<1x32xf32>
    %50 = arith.divf %48, %49 : vector<1x32xf32>
    %51 = arith.mulf %46, %46 : vector<4x32xf32>
    %cst_29 = arith.constant dense<0.000000e+00> : vector<32xf32>
    %52 = vector.multi_reduction <add>, %51, %cst_29 [0] : vector<4x32xf32> to vector<32xf32>
    %53 = vector.shape_cast %52 : vector<32xf32> to vector<1x32xf32>
    %cst_30 = arith.constant 4.000000e+00 : f32
    %54 = vector.broadcast %cst_30 : f32 to vector<1x32xf32>
    %55 = arith.divf %53, %54 : vector<1x32xf32>
    %56 = arith.mulf %50, %50 : vector<1x32xf32>
    %57 = arith.subf %55, %56 : vector<1x32xf32>
    %58 = vector.broadcast %50 : vector<1x32xf32> to vector<4x32xf32>
    %59 = arith.subf %46, %58 : vector<4x32xf32>
    %cst_31 = arith.constant 9.99999974E-6 : f32
    %60 = vector.broadcast %cst_31 : f32 to vector<1x32xf32>
    %61 = arith.addf %57, %60 : vector<1x32xf32>
    %62 = math.rsqrt %61 : vector<1x32xf32>
    %63 = vector.broadcast %62 : vector<1x32xf32> to vector<4x32xf32>
    %64 = arith.mulf %59, %63 : vector<4x32xf32>
    %65 = vector.broadcast %6 : vector<1x32xf32> to vector<4x32xf32>
    %66 = arith.mulf %64, %65 : vector<4x32xf32>
    %67 = vector.broadcast %10 : vector<1x32xf32> to vector<4x32xf32>
    %68 = arith.addf %66, %67 : vector<4x32xf32>
    %cst_32 = arith.constant 0.000000e+00 : f32
    %69 = vector.broadcast %cst_32 : f32 to vector<4x32xf32>
    %70 = arith.maximumf %68, %69 : vector<4x32xf32>
    %c1_33 = arith.constant 1 : index
    %c0_34 = arith.constant 0 : index
    %c0_35 = arith.constant 0 : index
    %71 = vector.load %arg2[%c1_33, %c0_34, %c0_35] : memref<4x32x32xf32, #tpu.memory_space<vmem>>, vector<1x32x32xf32>
    %72 = vector.shape_cast %71 : vector<1x32x32xf32> to vector<32x32xf32>
    %cst_36 = arith.constant dense<0.000000e+00> : vector<4x32xf32>
    %73 = tpu.matmul %70, %72, %cst_36 {dimension_numbers = #tpu.dot_dimension_numbers<[1], [0], [0], [1], [0, 0, 1, 1], [], []>} : vector<4x32xf32>, vector<32x32xf32>, vector<4x32xf32> -> vector<4x32xf32>
    %74 = vector.broadcast %2 : vector<1x32xf32> to vector<4x32xf32>
    %75 = arith.addf %73, %74 : vector<4x32xf32>
    %cst_37 = arith.constant dense<0.000000e+00> : vector<32xf32>
    %76 = vector.multi_reduction <add>, %75, %cst_37 [0] : vector<4x32xf32> to vector<32xf32>
    %77 = vector.shape_cast %76 : vector<32xf32> to vector<1x32xf32>
    %cst_38 = arith.constant 4.000000e+00 : f32
    %78 = vector.broadcast %cst_38 : f32 to vector<1x32xf32>
    %79 = arith.divf %77, %78 : vector<1x32xf32>
    %80 = arith.mulf %75, %75 : vector<4x32xf32>
    %cst_39 = arith.constant dense<0.000000e+00> : vector<32xf32>
    %81 = vector.multi_reduction <add>, %80, %cst_39 [0] : vector<4x32xf32> to vector<32xf32>
    %82 = vector.shape_cast %81 : vector<32xf32> to vector<1x32xf32>
    %cst_40 = arith.constant 4.000000e+00 : f32
    %83 = vector.broadcast %cst_40 : f32 to vector<1x32xf32>
    %84 = arith.divf %82, %83 : vector<1x32xf32>
    %85 = arith.mulf %79, %79 : vector<1x32xf32>
    %86 = arith.subf %84, %85 : vector<1x32xf32>
    %87 = vector.broadcast %79 : vector<1x32xf32> to vector<4x32xf32>
    %88 = arith.subf %75, %87 : vector<4x32xf32>
    %cst_41 = arith.constant 9.99999974E-6 : f32
    %89 = vector.broadcast %cst_41 : f32 to vector<1x32xf32>
    %90 = arith.addf %86, %89 : vector<1x32xf32>
    %91 = math.rsqrt %90 : vector<1x32xf32>
    %92 = vector.broadcast %91 : vector<1x32xf32> to vector<4x32xf32>
    %93 = arith.mulf %88, %92 : vector<4x32xf32>
    %94 = vector.broadcast %7 : vector<1x32xf32> to vector<4x32xf32>
    %95 = arith.mulf %93, %94 : vector<4x32xf32>
    %96 = vector.broadcast %11 : vector<1x32xf32> to vector<4x32xf32>
    %97 = arith.addf %95, %96 : vector<4x32xf32>
    %cst_42 = arith.constant 0.000000e+00 : f32
    %98 = vector.broadcast %cst_42 : f32 to vector<4x32xf32>
    %99 = arith.maximumf %97, %98 : vector<4x32xf32>
    %c2_43 = arith.constant 2 : index
    %c0_44 = arith.constant 0 : index
    %c0_45 = arith.constant 0 : index
    %100 = vector.load %arg2[%c2_43, %c0_44, %c0_45] : memref<4x32x32xf32, #tpu.memory_space<vmem>>, vector<1x32x32xf32>
    %101 = vector.shape_cast %100 : vector<1x32x32xf32> to vector<32x32xf32>
    %cst_46 = arith.constant dense<0.000000e+00> : vector<4x32xf32>
    %102 = tpu.matmul %99, %101, %cst_46 {dimension_numbers = #tpu.dot_dimension_numbers<[1], [0], [0], [1], [0, 0, 1, 1], [], []>} : vector<4x32xf32>, vector<32x32xf32>, vector<4x32xf32> -> vector<4x32xf32>
    %103 = vector.broadcast %3 : vector<1x32xf32> to vector<4x32xf32>
    %104 = arith.addf %102, %103 : vector<4x32xf32>
    %cst_47 = arith.constant dense<0.000000e+00> : vector<32xf32>
    %105 = vector.multi_reduction <add>, %104, %cst_47 [0] : vector<4x32xf32> to vector<32xf32>
    %106 = vector.shape_cast %105 : vector<32xf32> to vector<1x32xf32>
    %cst_48 = arith.constant 4.000000e+00 : f32
    %107 = vector.broadcast %cst_48 : f32 to vector<1x32xf32>
    %108 = arith.divf %106, %107 : vector<1x32xf32>
    %109 = arith.mulf %104, %104 : vector<4x32xf32>
    %cst_49 = arith.constant dense<0.000000e+00> : vector<32xf32>
    %110 = vector.multi_reduction <add>, %109, %cst_49 [0] : vector<4x32xf32> to vector<32xf32>
    %111 = vector.shape_cast %110 : vector<32xf32> to vector<1x32xf32>
    %cst_50 = arith.constant 4.000000e+00 : f32
    %112 = vector.broadcast %cst_50 : f32 to vector<1x32xf32>
    %113 = arith.divf %111, %112 : vector<1x32xf32>
    %114 = arith.mulf %108, %108 : vector<1x32xf32>
    %115 = arith.subf %113, %114 : vector<1x32xf32>
    %116 = vector.broadcast %108 : vector<1x32xf32> to vector<4x32xf32>
    %117 = arith.subf %104, %116 : vector<4x32xf32>
    %cst_51 = arith.constant 9.99999974E-6 : f32
    %118 = vector.broadcast %cst_51 : f32 to vector<1x32xf32>
    %119 = arith.addf %115, %118 : vector<1x32xf32>
    %120 = math.rsqrt %119 : vector<1x32xf32>
    %121 = vector.broadcast %120 : vector<1x32xf32> to vector<4x32xf32>
    %122 = arith.mulf %117, %121 : vector<4x32xf32>
    %123 = vector.broadcast %8 : vector<1x32xf32> to vector<4x32xf32>
    %124 = arith.mulf %122, %123 : vector<4x32xf32>
    %125 = vector.broadcast %12 : vector<1x32xf32> to vector<4x32xf32>
    %126 = arith.addf %124, %125 : vector<4x32xf32>
    %cst_52 = arith.constant 0.000000e+00 : f32
    %127 = vector.broadcast %cst_52 : f32 to vector<4x32xf32>
    %128 = arith.maximumf %126, %127 : vector<4x32xf32>
    %c3_53 = arith.constant 3 : index
    %c0_54 = arith.constant 0 : index
    %c0_55 = arith.constant 0 : index
    %129 = vector.load %arg2[%c3_53, %c0_54, %c0_55] : memref<4x32x32xf32, #tpu.memory_space<vmem>>, vector<1x32x32xf32>
    %130 = vector.shape_cast %129 : vector<1x32x32xf32> to vector<32x32xf32>
    %cst_56 = arith.constant dense<0.000000e+00> : vector<4x32xf32>
    %131 = tpu.matmul %128, %130, %cst_56 {dimension_numbers = #tpu.dot_dimension_numbers<[1], [0], [0], [1], [0, 0, 1, 1], [], []>} : vector<4x32xf32>, vector<32x32xf32>, vector<4x32xf32> -> vector<4x32xf32>
    %132 = vector.broadcast %4 : vector<1x32xf32> to vector<4x32xf32>
    %133 = arith.addf %131, %132 : vector<4x32xf32>
    %c0_57 = arith.constant 0 : index
    %c0_58 = arith.constant 0 : index
    %134 = vector.load %arg4[%c0_57, %c0_58] : memref<4x32xf32, #tpu.memory_space<vmem>>, vector<4x32xf32>
    tpu.vector_store %arg4[%c0_57, %c0_58], %133 {strides = array<i32>} : memref<4x32xf32, #tpu.memory_space<vmem>>, vector<4x32xf32>,
    return
  }
}

</mosaic_0001>

<bundles_post_ra>
// kernel: tpu_custom_call.1
= control target key start
LH: loop header
LB: loop body
LE: loop exit
PB: predicated region body
PF: predicated region fallthrough
CT: control target
= control target key end

     0   :  { %9 = vsyncpa [#allocation3], 0  ;;  %s1022_s0 = inlined_call_operand.hbm [shape: f32[4,8], index: 0, kind: input, shape index: {}]   ;;  %s1023_s1 = inlined_call_operand.hbm [shape: f32[8,32], index: 1, kind: input, shape index: {}]   ;;  %s1024_s2 = inlined_call_operand.hbm [shape: f32[4,32,32], index: 2, kind: input, shape index: {}]   ;;  %s1025_s3 = inlined_call_operand.hbm [shape: f32[16,32], index: 3, kind: input, shape index: {}]   ;;  %s1026_s4 = inlined_call_operand.hbm [shape: f32[4,32], index: 4, kind: output, shape index: {}]  }
   0x1   :  { %10 = vsyncpa [#allocation6], 0 }
   0x2   :  { %11 = vsyncpa [#allocation9], 0 }
   0x3   :  { %12 = vsyncpa [#allocation4], 0  ;;  %s895_s15 = smov [#allocation5]   ;;  %s896_s17 = smov [#allocation2]  }
   0x4   :  { %s29_s16 = sshll.u32 %s895_s15, 4  ;;  %s19_s18 = sshll.u32 %s896_s17, 4  ;;  %s30_s16 = int_to_ptr.vmem [resolvable:$true] %s29_s16  ;;  %s20_s18 = int_to_ptr.vmem [resolvable:$true] %s19_s18 }
   0x5   :  { %s777_s21 = scalar_lea.hbm %s1023_s1, 128 }
   0x6   :  { %p778_p0 = scmp.ne.s32.totalorder %s1023_s1, %s777_s21  ;;  %p781_p1 = scmp.lt.u32.totalorder %s777_s21, %s1023_s1 }
   0x8   :  { %p783_p2 = pnand %p781_p1, %p778_p0 }
   0xa   :  { %786 = shalt.err (!%p783_p2)
}
   0xb   :  { %s787_s26 = scalar_lea.vmem %s30_s16, 128  ;;  %p792_p4 = scmp.lt.s32.totalorder %s30_s16, %s30_s16 }
   0xc   :  { %p788_p3 = scmp.ne.s32.totalorder %s30_s16, %s787_s26  ;;  %p793_p5 = scmp.lt.s32.totalorder %s787_s26, %s787_s26 }
   0xe   :  { %p794_p6 = por %p793_p5, %p792_p4 }
  0x10   :  { %p795_p7 = pnand %p794_p6, %p788_p3 }
  0x12   :  { %798 = shalt.err (!%p795_p7)
}
  0x13   :  { %32 = dma.hbm_to_vmem [thread:$0]  %s1023_s1, 128, %s30_s16, [#allocation6]  }
  0x14   :  { %s799_s5 = scalar_lea.hbm %s1022_s0, 64 }
  0x15   :  { %p800_p8 = scmp.ne.s32.totalorder %s1022_s0, %s799_s5  ;;  %p803_p9 = scmp.lt.u32.totalorder %s799_s5, %s1022_s0 }
  0x17   :  { %p805_p10 = pnand %p803_p9, %p800_p8 }
  0x19   :  { %808 = shalt.err (!%p805_p10)
}
  0x1a   :  { %s809_s10 = scalar_lea.vmem %s20_s18, 64  ;;  %p814_p12 = scmp.lt.s32.totalorder %s20_s18, %s20_s18 }
  0x1b   :  { %p810_p11 = scmp.ne.s32.totalorder %s20_s18, %s809_s10  ;;  %p815_p13 = scmp.lt.s32.totalorder %s809_s10, %s809_s10 }
  0x1d   :  { %p816_p0 = por %p815_p13, %p814_p12 }
  0x1f   :  { %p817_p1 = pnand %p816_p0, %p810_p11 }
  0x21   :  { %820 = shalt.err (!%p817_p1)
}
  0x22   :  { %22 = dma.hbm_to_vmem [thread:$0]  %s1022_s0, 64, %s20_s18, [#allocation3]  }
  0x23   :  { %s897_s12 = smov [#allocation7]   ;;  %s821_s16 = scalar_lea.hbm %s1024_s2, 2048 }
  0x24   :  { %s38_s13 = sshll.u32 %s897_s12, 4  ;;  %p822_p2 = scmp.ne.s32.totalorder %s1024_s2, %s821_s16  ;;  %s39_s13 = int_to_ptr.vmem [resolvable:$true] %s38_s13 }
  0x25   :  { %p825_p3 = scmp.lt.u32.totalorder %s821_s16, %s1024_s2 }
  0x27   :  { %p827_p4 = pnand %p825_p3, %p822_p2 }
  0x29   :  { %830 = shalt.err (!%p827_p4)
}
  0x2a   :  { %s831_s22 = scalar_lea.vmem %s39_s13, 2048  ;;  %p836_p6 = scmp.lt.s32.totalorder %s39_s13, %s39_s13 }
  0x2b   :  { %p832_p5 = scmp.ne.s32.totalorder %s39_s13, %s831_s22  ;;  %p837_p7 = scmp.lt.s32.totalorder %s831_s22, %s831_s22 }
  0x2d   :  { %p838_p8 = por %p837_p7, %p836_p6 }
  0x2f   :  { %p839_p9 = pnand %p838_p8, %p832_p5 }
  0x31   :  { %842 = shalt.err (!%p839_p9)
}
  0x32   :  { %s898_s0 = smov 128   ;;  %s899_s18 = smov 8  }
  0x33   :  { %44 = dma.hbm_to_vmem [thread:$0]  %s1024_s2, 2048, %s39_s13, [#allocation6], %s898_s0, %s898_s0, %s899_s18  }
  0x34   :  { %s900_s25 = smov [#allocation8]   ;;  %s843_s29 = scalar_lea.hbm %s1025_s3, 256 }
  0x35   :  { %s50_s26 = sshll.u32 %s900_s25, 4  ;;  %p844_p10 = scmp.ne.s32.totalorder %s1025_s3, %s843_s29  ;;  %s51_s26 = int_to_ptr.vmem [resolvable:$true] %s50_s26 }
  0x36   :  { %p847_p11 = scmp.lt.u32.totalorder %s843_s29, %s1025_s3 }
  0x38   :  { %p849_p12 = pnand %p847_p11, %p844_p10 }
  0x3a   :  { %852 = shalt.err (!%p849_p12)
}
  0x3b   :  { %s853_s8 = scalar_lea.vmem %s51_s26, 256  ;;  %p858_p0 = scmp.lt.s32.totalorder %s51_s26, %s51_s26 }
  0x3c   :  { %p854_p13 = scmp.ne.s32.totalorder %s51_s26, %s853_s8  ;;  %p859_p1 = scmp.lt.s32.totalorder %s853_s8, %s853_s8 }
  0x3e   :  { %p860_p2 = por %p859_p1, %p858_p0 }
  0x40   :  { %p861_p3 = pnand %p860_p2, %p854_p13 }
  0x42   :  { %864 = shalt.err (!%p861_p3)
}
  0x43   :  { %56 = dma.hbm_to_vmem [thread:$0]  %s1025_s3, 256, %s51_s26, [#allocation9], %s898_s0, %s898_s0, %s899_s18  }
  0x44   :  { %887 = dma.done.wait [#allocation3], 64  }
  0x45   :  { %888 = vsyncadd [#allocation3], 4294967232 }
  0x46   :  { %889 = dma.done.wait [#allocation6], 2176  }
  0x47   :  { %890 = vsyncadd [#allocation6], 4294965120 }
  0x48   :  { %891 = dma.done.wait [#allocation9], 256  }
  0x49   :  { %892 = vsyncadd [#allocation9], 4294967040  ;;  %v901_v0 = vmov 0.0   ;;  %vm902_vm0 = vmmov 0   ;;  %vm88_vm1 = vcmask 64512   ;;  %v83_v1 = vld [vmem:[#allocation5] sm:$0xff] }
  0x4a   :  { %686 = vmatprep.subr.mxu0 %v901_v0  ;;  %688 = vmatprep.mubr.msk.f32.mxu0 %vm902_vm0, %v901_v0  ;;  %v82_v2 = vld [vmem:[#allocation2] sm:$0xf]  ;;  %v198_v3 = vld [vmem:[#allocation7] sm:$0xff]  ;;  %v199_v4 = vld [vmem:[#allocation7 + $0x8] sm:$0xff]  ;;  %v903_v6 = vmov 0.0|0.0   ;;  %vm162_vm2 = vcmask 257024  }
  0x4b   :  { %699 = vmatprep.mubr.msk.f32.mxu1 %vm902_vm0, %v901_v0  ;;  %687 = vmatpush3.msra.mxu0 %v83_v1  ;;  %v736_v5 = vpack.c.bf16 %v199_v4, %v198_v3  ;;  %v200_v7 = vld [vmem:[#allocation7 + $0x10] sm:$0xff]  ;;  %v201_v8 = vld [vmem:[#allocation7 + $0x18] sm:$0xff]  ;;  %v646_v10 = vld [vmem:[#allocation8] ss:$0 sm:$0xff]  ;;  %vm206_vm3 = vcmask 261120   ;;  %s904_s3 = smov [#allocation10]  }
  0x4c   :  { %689 = vmatmul.mubr.msk.f32.vlgmr.msra.gmra.mrb[0].mxu0 %vm88_vm1, %v82_v2  ;;  %735 = vmatprep.subr.bf16.mxu1 %v903_v6  ;;  %v739_v9 = vpack.c.bf16 %v201_v8, %v200_v7  ;;  %v648_v36 = vld [vmem:[#allocation8 + $0x5] ss:$0 sm:$0xff]  ;;  %v649_v38 = vld [vmem:[#allocation8 + $0x9] ss:$0 sm:$0xff]  ;;  %v317_v45 = vld [vmem:[#allocation7 + $0x30] sm:$0xff]  ;;  %s635_s10 = sshll.u32 %s904_s3, 4  ;;  %s636_s10 = int_to_ptr.vmem [resolvable:$true] %s635_s10 }
  0x4d   :  { %710 = vmatprep.mubr.msk.f32.mxu0 %vm902_vm0, %v901_v0  ;;  %741 = vmatprep.subr.bf16.mxu0 %v903_v6  ;;  %v315_v42 = vld [vmem:[#allocation7 + $0x20] sm:$0xff]  ;;  %v316_v43 = vld [vmem:[#allocation7 + $0x28] sm:$0xff]  ;;  %v318_v46 = vld [vmem:[#allocation7 + $0x38] sm:$0xff]  ;;  %s865_s1 = scalar_lea.vmem %s636_s10, 64  ;;  %p870_p5 = scmp.lt.s32.totalorder %s636_s10, %s636_s10 }
  0x4e   :  { %737 = vmatpush3.bf16.msra.mxu1 %v736_v5  ;;  %v742_v44 = vpack.c.bf16 %v316_v43, %v315_v42  ;;  %v745_v47 = vpack.c.bf16 %v318_v46, %v317_v45  ;;  %v650_v48 = vld [vmem:[#allocation8 + $0x1] ss:$0 sm:$0xff]  ;;  %p866_p4 = scmp.ne.s32.totalorder %s636_s10, %s865_s1  ;;  %p871_p6 = scmp.lt.s32.totalorder %s865_s1, %s865_s1 }
  0x4f   :  { %738 = vmatprep.subr.bf16.mxu1 %v903_v6 }
  0x50   :  { %743 = vmatpush3.bf16.msra.mxu0 %v742_v44  ;;  %p872_p7 = por %p871_p6, %p870_p5 }
  0x51   :  { %744 = vmatprep.subr.bf16.mxu0 %v903_v6 }
  0x52   :  { %740 = vmatpush3.bf16.msra.mxu1 %v739_v9  ;;  %p873_p8 = pnand %p872_p7, %p866_p4 }
  0x53   :  { %747 = vmatprep.subr.bf16.mxu1 %v903_v6 }
  0x54   :  { %746 = vmatpush3.bf16.msra.mxu0 %v745_v47 }
  0x55   :  { %753 = vmatprep.subr.bf16.mxu0 %v903_v6 }
 0x11f   :  { %v158_v11 = vpop.f32.mrb[0].mxu0 }
 0x120   :  { %v159_v12 = vadd.f32 %v646_v10, %v158_v11  ;;  %v690_v13 = vpop.f32.mrb[1].mxu0 }
 0x122   :  { %v163_v14 = vsel %vm162_vm2, %v159_v12, 0.0  ;;  %v172_v15 = vmul.f32 %v159_v12, %v159_v12 }
 0x123   :  { %v164_v16 = vrot.slane %v163_v14, 4 }
 0x124   :  { %v173_v17 = vsel %vm162_vm2, %v172_v15, 0.0 }
 0x125   :  { %v165_v18 = vadd.f32 %v164_v16, %v163_v14  ;;  %v174_v19 = vrot.slane %v173_v17, 4  ;;  %v653_v14 = vld [vmem:[#allocation8 + $0xa] ss:$0 sm:$0xff] }
 0x127   :  { %v166_v20 = vrot.slane %v165_v18, 2  ;;  %v175_v21 = vadd.f32 %v174_v19, %v173_v17  ;;  %v432_v19 = vld [vmem:[#allocation7 + $0x48] sm:$0xff] }
 0x129   :  { %v167_v22 = vadd.f32 %v166_v20, %v165_v18  ;;  %v176_v23 = vrot.slane %v175_v21, 2  ;;  %v431_v18 = vld [vmem:[#allocation7 + $0x40] sm:$0xff] }
 0x12a   :  { %v748_v20 = vpack.c.bf16 %v432_v19, %v431_v18 }
 0x12b   :  { %v168_v24 = vrot.slane %v167_v22, 1  ;;  %v177_v25 = vadd.f32 %v176_v23, %v175_v21  ;;  %v433_v21 = vld [vmem:[#allocation7 + $0x50] sm:$0xff] }
 0x12d   :  { %v169_v26 = vadd.f32 %v168_v24, %v167_v22  ;;  %v178_v27 = vrot.slane %v177_v25, 1  ;;  %v434_v22 = vld [vmem:[#allocation7 + $0x58] sm:$0xff]  ;;  %v654_v24 = vld [vmem:[#allocation8 + $0x2] ss:$0 sm:$0xff] }
 0x12e   :  { %v751_v23 = vpack.c.bf16 %v434_v22, %v433_v21 }
 0x12f   :  { %v171_v28 = vmul.f32 0.25, %v169_v26  ;;  %v179_v29 = vadd.f32 %v178_v27, %v177_v25 }
 0x131   :  { %v180_v30 = vmul.f32 0.25, %v179_v29  ;;  %v181_v31 = vmul.f32 %v171_v28, %v171_v28  ;;  %v183_v34 = vsub.f32 %v159_v12, %v171_v28  ;;  %v652_v12 = vld [vmem:[#allocation8 + $0x6] ss:$0 sm:$0xff] }
 0x133   :  { %v182_v32 = vsub.f32 %v180_v30, %v181_v31 }
 0x135   :  { %v184_v33 = vadd.f32 1e-05, %v182_v32 }
 0x137   :  { %769 = vrsqrt.f32 %v184_v33 }
 0x141   :  { %v770_v35 = vpop.eup %769 }
 0x142   :  { %v186_v37 = vmul.f32 %v770_v35, %v183_v34 }
 0x144   :  { %v191_v39 = vmul.f32 %v648_v36, %v186_v37 }
 0x146   :  { %v196_v40 = vadd.f32 %v649_v38, %v191_v39 }
 0x148   :  { %v197_v41 = vmax.f32 %v196_v40, 0.0 }
 0x14a   :  { %700 = vmatmul.mubr.msk.f32.vlgmr.msra.gmra.mrb[0].mxu1 %vm206_vm3, %v197_v41 }
 0x14b   :  { %721 = vmatprep.mubr.msk.f32.mxu1 %vm902_vm0, %v901_v0  ;;  %749 = vmatpush3.bf16.msra.mxu1 %v748_v20 }
 0x14c   :  { %750 = vmatprep.subr.bf16.mxu1 %v903_v6 }
 0x14f   :  { %752 = vmatpush3.bf16.msra.mxu1 %v751_v23 }
 0x21d   :  { %v276_v49 = vpop.f32.mrb[0].mxu1 }
 0x21e   :  { %v277_v50 = vadd.f32 %v650_v48, %v276_v49  ;;  %v701_v51 = vpop.f32.mrb[1].mxu1  ;;  %v656_v49 = vld [vmem:[#allocation8 + $0x7] ss:$0 sm:$0xff] }
 0x21f   :  { %v657_v51 = vld [vmem:[#allocation8 + $0xb] ss:$0 sm:$0xff] }
 0x220   :  { %v280_v52 = vsel %vm162_vm2, %v277_v50, 0.0  ;;  %v288_v53 = vmul.f32 %v277_v50, %v277_v50 }
 0x221   :  { %v281_v54 = vrot.slane %v280_v52, 4 }
 0x222   :  { %v289_v55 = vsel %vm162_vm2, %v288_v53, 0.0 }
 0x223   :  { %v282_v56 = vadd.f32 %v281_v54, %v280_v52  ;;  %v290_v57 = vrot.slane %v289_v55, 4 }
 0x225   :  { %v283_v58 = vrot.slane %v282_v56, 2  ;;  %v291_v59 = vadd.f32 %v290_v57, %v289_v55  ;;  %v547_v55 = vld [vmem:[#allocation7 + $0x60] sm:$0xff] }
 0x227   :  { %v284_v60 = vadd.f32 %v283_v58, %v282_v56  ;;  %v292_v61 = vrot.slane %v291_v59, 2  ;;  %v548_v56 = vld [vmem:[#allocation7 + $0x68] sm:$0xff]  ;;  %v549_v58 = vld [vmem:[#allocation7 + $0x70] sm:$0xff] }
 0x228   :  { %v754_v57 = vpack.c.bf16 %v548_v56, %v547_v55 }
 0x229   :  { %v285_v62 = vrot.slane %v284_v60, 1  ;;  %v293_v63 = vadd.f32 %v292_v61, %v291_v59  ;;  %v550_v59 = vld [vmem:[#allocation7 + $0x78] sm:$0xff]  ;;  %v658_v61 = vld [vmem:[#allocation8 + $0x3] ss:$0 sm:$0xff] }
 0x22b   :  { %v286_v1 = vadd.f32 %v285_v62, %v284_v60  ;;  %v294_v2 = vrot.slane %v293_v63, 1  ;;  %v757_v60 = vpack.c.bf16 %v550_v59, %v549_v58 }
 0x22d   :  { %v287_v3 = vmul.f32 0.25, %v286_v1  ;;  %v295_v4 = vadd.f32 %v294_v2, %v293_v63 }
 0x22f   :  { %v296_v5 = vmul.f32 0.25, %v295_v4  ;;  %v297_v7 = vmul.f32 %v287_v3, %v287_v3  ;;  %v299_v10 = vsub.f32 %v277_v50, %v287_v3 }
 0x231   :  { %v298_v8 = vsub.f32 %v296_v5, %v297_v7 }
 0x233   :  { %v300_v9 = vadd.f32 1e-05, %v298_v8 }
 0x235   :  { %771 = vrsqrt.f32 %v300_v9 }
 0x23f   :  { %v772_v11 = vpop.eup %771 }
 0x240   :  { %v302_v13 = vmul.f32 %v772_v11, %v299_v10 }
 0x242   :  { %v307_v15 = vmul.f32 %v652_v12, %v302_v13 }
 0x244   :  { %v312_v16 = vadd.f32 %v653_v14, %v307_v15 }
 0x246   :  { %v313_v17 = vmax.f32 %v312_v16, 0.0 }
 0x248   :  { %711 = vmatmul.mubr.msk.f32.vlgmr.msra.gmra.mrb[2].mxu0 %vm206_vm3, %v313_v17 }
 0x249   :  { %732 = vmatprep.mubr.msk.f32.mxu0 %vm902_vm0, %v901_v0  ;;  %755 = vmatpush3.bf16.msra.mxu0 %v754_v57 }
 0x24a   :  { %756 = vmatprep.subr.bf16.mxu0 %v903_v6 }
 0x24d   :  { %758 = vmatpush3.bf16.msra.mxu0 %v757_v60 }
 0x31b   :  { %v392_v25 = vpop.f32.mrb[2].mxu0 }
 0x31c   :  { %v393_v26 = vadd.f32 %v654_v24, %v392_v25  ;;  %v712_v27 = vpop.f32.mrb[3].mxu0  ;;  %v660_v24 = vld [vmem:[#allocation8 + $0x8] ss:$0 sm:$0xff] }
 0x31e   :  { %v396_v28 = vsel %vm162_vm2, %v393_v26, 0.0  ;;  %v404_v29 = vmul.f32 %v393_v26, %v393_v26 }
 0x31f   :  { %v397_v30 = vrot.slane %v396_v28, 4 }
 0x320   :  { %v405_v0 = vsel %vm162_vm2, %v404_v29, 0.0 }
 0x321   :  { %v398_v31 = vadd.f32 %v397_v30, %v396_v28  ;;  %v406_v32 = vrot.slane %v405_v0, 4  ;;  %v662_v30 = vld [vmem:[#allocation8 + $0x4] ss:$0 sm:$0xff] }
 0x323   :  { %v399_v33 = vrot.slane %v398_v31, 2  ;;  %v407_v34 = vadd.f32 %v406_v32, %v405_v0 }
 0x325   :  { %v400_v35 = vadd.f32 %v399_v33, %v398_v31  ;;  %v408_v36 = vrot.slane %v407_v34, 2 }
 0x327   :  { %v401_v37 = vrot.slane %v400_v35, 1  ;;  %v409_v38 = vadd.f32 %v408_v36, %v407_v34 }
 0x329   :  { %v402_v39 = vadd.f32 %v401_v37, %v400_v35  ;;  %v410_v40 = vrot.slane %v409_v38, 1 }
 0x32b   :  { %v403_v41 = vmul.f32 0.25, %v402_v39  ;;  %v411_v42 = vadd.f32 %v410_v40, %v409_v38 }
 0x32d   :  { %v412_v43 = vmul.f32 0.25, %v411_v42  ;;  %v413_v44 = vmul.f32 %v403_v41, %v403_v41  ;;  %v415_v47 = vsub.f32 %v393_v26, %v403_v41  ;;  %v661_v26 = vld [vmem:[#allocation8 + $0xc] ss:$0 sm:$0xff] }
 0x32f   :  { %v414_v45 = vsub.f32 %v412_v43, %v413_v44 }
 0x331   :  { %v416_v46 = vadd.f32 1e-05, %v414_v45 }
 0x333   :  { %773 = vrsqrt.f32 %v416_v46 }
 0x33d   :  { %v774_v48 = vpop.eup %773 }
 0x33e   :  { %v418_v50 = vmul.f32 %v774_v48, %v415_v47 }
 0x340   :  { %v423_v52 = vmul.f32 %v656_v49, %v418_v50 }
 0x342   :  { %v428_v53 = vadd.f32 %v657_v51, %v423_v52 }
 0x344   :  { %v429_v54 = vmax.f32 %v428_v53, 0.0 }
 0x346   :  { %722 = vmatmul.mubr.msk.f32.vlgmr.msra.gmra.mrb[2].mxu1 %vm206_vm3, %v429_v54 }
 0x419   :  { %v508_v62 = vpop.f32.mrb[2].mxu1 }
 0x41a   :  { %v509_v63 = vadd.f32 %v658_v61, %v508_v62  ;;  %v723_v1 = vpop.f32.mrb[3].mxu1 }
 0x41c   :  { %v512_v2 = vsel %vm162_vm2, %v509_v63, 0.0  ;;  %v520_v3 = vmul.f32 %v509_v63, %v509_v63 }
 0x41d   :  { %v513_v4 = vrot.slane %v512_v2, 4 }
 0x41e   :  { %v521_v5 = vsel %vm162_vm2, %v520_v3, 0.0 }
 0x41f   :  { %v514_v7 = vadd.f32 %v513_v4, %v512_v2  ;;  %v522_v8 = vrot.slane %v521_v5, 4 }
 0x421   :  { %v515_v9 = vrot.slane %v514_v7, 2  ;;  %v523_v10 = vadd.f32 %v522_v8, %v521_v5 }
 0x423   :  { %v516_v11 = vadd.f32 %v515_v9, %v514_v7  ;;  %v524_v6 = vrot.slane %v523_v10, 2 }
 0x425   :  { %v517_v12 = vrot.slane %v516_v11, 1  ;;  %v525_v13 = vadd.f32 %v524_v6, %v523_v10 }
 0x427   :  { %v518_v14 = vadd.f32 %v517_v12, %v516_v11  ;;  %v526_v15 = vrot.slane %v525_v13, 1 }
 0x429   :  { %v519_v16 = vmul.f32 0.25, %v518_v14  ;;  %v527_v17 = vadd.f32 %v526_v15, %v525_v13 }
 0x42b   :  { %v528_v18 = vmul.f32 0.25, %v527_v17  ;;  %v529_v19 = vmul.f32 %v519_v16, %v519_v16  ;;  %v531_v22 = vsub.f32 %v509_v63, %v519_v16 }
 0x42d   :  { %v530_v20 = vsub.f32 %v528_v18, %v529_v19 }
 0x42f   :  { %v532_v21 = vadd.f32 1e-05, %v530_v20 }
 0x431   :  { %775 = vrsqrt.f32 %v532_v21 }
 0x43b   :  { %v776_v23 = vpop.eup %775 }
 0x43c   :  { %v534_v25 = vmul.f32 %v776_v23, %v531_v22 }
 0x43e   :  { %v539_v27 = vmul.f32 %v660_v24, %v534_v25 }
 0x440   :  { %v544_v28 = vadd.f32 %v661_v26, %v539_v27 }
 0x442   :  { %v545_v29 = vmax.f32 %v544_v28, 0.0 }
 0x444   :  { %733 = vmatmul.mubr.msk.f32.vlgmr.msra.gmra.mrb[4].mxu0 %vm206_vm3, %v545_v29 }
 0x517   :  { %v624_v0 = vpop.f32.mrb[4].mxu0 }
 0x518   :  { %v625_v31 = vadd.f32 %v662_v30, %v624_v0  ;;  %v734_v32 = vpop.f32.mrb[5].mxu0 }
 0x51a   :  { %628 = vst.msk [vmem:[#allocation10] sm:$0xf] %vm162_vm2, %v625_v31 }
 0x51b   :  { %876 = shalt.err (!%p873_p8)
}
 0x51c   :  { %s877_s13 = scalar_lea.hbm %s1026_s4, 64 }
 0x51d   :  { %p878_p9 = scmp.ne.s32.totalorder %s1026_s4, %s877_s13  ;;  %p881_p10 = scmp.lt.u32.totalorder %s877_s13, %s1026_s4 }
 0x51f   :  { %p883_p11 = pnand %p881_p10, %p878_p9 }
 0x521   :  { %886 = shalt.err (!%p883_p11)
}
 0x522   :  { %638 = dma.vmem_to_hbm [thread:$0]  %s636_s10, 64, %s1026_s4, [#allocation4]  }
 0x523   :  { %893 = dma.done.wait [#allocation4], 64  }
 0x524   :  { %894 = vsyncadd [#allocation4], 4294967232 }
 0x525   :  { %642 = vsyncpa [#allocation3], 1 }
 0x526   :  { %643 = vsyncpa [#allocation6], 1 }
 0x527   :  { %644 = vsyncpa [#allocation9], 1 }
 0x528   :  { %645 = vsyncpa [#allocation4], 1 }

</bundles_post_ra>
